<compile_context>
chip_gen: v6e
topology: v6e:2x2x1
jax: 0.10.0
libtpu: 0.0.40
codegen_flags: <defaults>
</compile_context>

<pallas_src>
import functools

import jax
import jax.numpy as jnp
from jax.experimental import pallas as pl
from jax.experimental.pallas import tpu as pltpu


_NEG_BIG = -1e30  # "-inf" for masked softmax without inf arithmetic
_VMEM_LIMIT_BYTES = 32 * 1024 * 1024  # safe on every generation (v7x TC: 64 MiB phys)


def _attention_head_kernel(x_ref, w_ref, bw_ref, v_ref, o_ref, *, seq_len):
    # x_ref  : (TB, S_pad, C)   hidden states (streaming dtype, e.g. f32/bf16)
    # w_ref  : (C, H)           W.weight.T, cast to x's dtype (MXU input)
    # bw_ref : (1, H)           W.bias, f32
    # v_ref  : (1, H)           V.weight as a row vector, f32
    # o_ref  : (1, TB, C)       context vectors for this batch tile
    TB, S_pad, C = x_ref.shape

    x = x_ref[...]
    # Free collapse: the wrapper guarantees S_pad % 8 == 0, so this reshape
    # never crosses an (8, 128) tile boundary (no VMEM relayout copy).
    x2 = x.reshape(TB * S_pad, C)

    # att = tanh(x @ W^T + bW): one MXU matmul for the whole tile, f32 acc.
    att = jnp.tanh(
        jnp.dot(x2, w_ref[...], preferred_element_type=jnp.float32)
        + bw_ref[...]
    )                                                   # (TB*S_pad, H) f32

    # score = att @ V^T  (V.bias dropped: softmax is shift invariant, so a
    # scalar added to every score cancels exactly).  Lane reduction on VPU/XLU.
    score = jnp.sum(att * v_ref[...], axis=-1, keepdims=True)
    score = score.reshape(TB, S_pad, 1)                 # (TB, S_pad, 1)

    if seq_len != S_pad:
        # Mask padded sequence positions out of the softmax.
        pos = jax.lax.broadcasted_iota(jnp.int32, (TB, S_pad, 1), 1)
        score = jnp.where(pos < seq_len, score, _NEG_BIG)

    # Softmax over the sequence axis, per batch row; normalization folded into
    # a single per-lane multiply after the weighted sum.
    m = jnp.max(score, axis=1, keepdims=True)           # (TB, 1, 1)
    e = jnp.exp(score - m)                              # (TB, S_pad, 1)
    denom = jnp.sum(e, axis=1)                          # (TB, 1)

    weighted = jnp.sum(e * x.astype(jnp.float32), axis=1)        # (TB, C) f32
    ctx = weighted * pl.reciprocal(denom, approx=True)           # EUP vrcp (free slot)
    o_ref[...] = ctx[None].astype(o_ref.dtype)


def _pick_batch_tile(B, S_pad, C, H, x_itemsize):
    # Dominant per-step VMEM: double-buffered x tile + the f32 tanh activation.
    # Keep them under ~half the scoped limit so weights / pipeline overhead fit.
    per_row = S_pad * (2 * C * x_itemsize + 4 * H)
    tile = max(1, min(B, (_VMEM_LIMIT_BYTES // 2) // max(per_row, 1)))
    # If everything fits in one step but the work is large, split into two
    # "parallel" steps so both v7x TensorCores get work; 256+ MXU rows per
    # step keeps the extra pipeline step essentially free on 1-TC v5e/v6e.
    if tile >= B and B >= 2 and pl.cdiv(B, 2) * S_pad >= 256:
        tile = pl.cdiv(B, 2)
    return tile


def attention_head(hidden_states, w, bw, v, bv=None, *, batch_tile=None):
    """hidden_states: (B,S,C); w: (C,H) = W.weight.T; bw: (H,); v: (H,1) = V.weight.T.

    bv (V.bias) is accepted for API parity but unused: it cancels under softmax.
    Pass hidden_states (and w) in bf16 to halve HBM traffic on this
    bandwidth-bound kernel; all non-MXU math runs in f32 inside the kernel.
    """
    del bv
    B, S, C = hidden_states.shape
    H = w.shape[1]
    dtype = hidden_states.dtype

    # Pad the sequence axis to a sublane multiple so the in-kernel collapse
    # reshape is a pure layout no-op; padded positions are masked in-kernel.
    S_pad = 8 * pl.cdiv(S, 8)
    if S_pad != S:
        hidden_states = jnp.pad(hidden_states, ((0, 0), (0, S_pad - S), (0, 0)))

    if batch_tile is None:
        batch_tile = _pick_batch_tile(B, S_pad, C, H, jnp.dtype(dtype).itemsize)
    grid = pl.cdiv(B, batch_tile)
    b_pad = grid * batch_tile
    if b_pad != B:
        # Padded batch rows produce harmless context vectors, sliced off below.
        hidden_states = jnp.pad(hidden_states, ((0, b_pad - B), (0, 0), (0, 0)))

    w_in = w.astype(dtype)                       # MXU runs in the streaming dtype
    bw2 = bw.reshape(1, H).astype(jnp.float32)   # bias/score math stays f32
    v_row = v.reshape(1, H).astype(jnp.float32)

    kernel = functools.partial(_attention_head_kernel, seq_len=S)

    out = pl.pallas_call(
        kernel,
        out_shape=jax.ShapeDtypeStruct((grid, batch_tile, C), dtype),
        grid_spec=pltpu.PrefetchScalarGridSpec(
            num_scalar_prefetch=0,
            grid=(grid,),
            in_specs=[
                pl.BlockSpec((batch_tile, S_pad, C), lambda b: (b, 0, 0)),
                # Grid-resident weights (constant index_map).  At large C,H add
                # pipeline_mode=pl.Buffered(1) to drop the unused second buffer.
                pl.BlockSpec((C, H), lambda b: (0, 0)),
                pl.BlockSpec((1, H), lambda b: (0, 0)),
                pl.BlockSpec((1, H), lambda b: (0, 0)),
            ],
            out_specs=pl.BlockSpec((1, batch_tile, C), lambda b: (b, 0, 0)),
        ),
        compiler_params=pltpu.CompilerParams(
            dimension_semantics=("parallel",),
            vmem_limit_bytes=_VMEM_LIMIT_BYTES,
        ),
    )(hidden_states, w_in, bw2, v_row)
    return out.reshape(b_pad, C)[:B]


def attention_head_ref(x, w, bw, v, bv):
    att = jnp.tanh(jnp.einsum("bsc,ch->bsh", x, w) + bw)
    score = jnp.einsum("bsh,hk->bsk", att, v) + bv            # (B, S, 1)
    att_w = jax.nn.softmax(score, axis=1)
    return jnp.sum(att_w * x, axis=1)


if __name__ == "__main__":
    B, S, C, H = 4, 8, 32, 32  # batch, seq, cat_size, hidden_size

    key = jax.random.PRNGKey(0)
    kx, kw, kbw, kv, kbv, kx2 = jax.random.split(key, 6)

    hidden_states = jax.random.normal(kx, (B, S, C), dtype=jnp.float32)
    # Parameters follow nn.Linear(cat_size, hidden), nn.Linear(hidden, 1);
    # stored transposed so the kernel does x @ W.
    w = jax.random.normal(kw, (C, H), dtype=jnp.float32) * 0.1
    bw = jax.random.normal(kbw, (H,), dtype=jnp.float32) * 0.1
    v = jax.random.normal(kv, (H, 1), dtype=jnp.float32) * 0.1
    bv = jax.random.normal(kbv, (1,), dtype=jnp.float32) * 0.1

    # f32 streaming path (single grid step on every generation at this size).
    out = jax.block_until_ready(attention_head(hidden_states, w, bw, v, bv))
    ref = attention_head_ref(hidden_states, w, bw, v, bv)
    assert out.shape == (B, C)
    assert jnp.allclose(out, ref, atol=2e-3, rtol=2e-3)  # approx-reciprocal tolerance

    # bf16 streaming path + non-multiple-of-8 sequence (exercises the softmax
    # padding mask and the half-bandwidth x/W stream).
    B2, S2 = 3, 6
    x2 = jax.random.normal(kx2, (B2, S2, C), dtype=jnp.float32)
    out2 = jax.block_until_ready(
        attention_head(x2.astype(jnp.bfloat16), w.astype(jnp.bfloat16), bw, v, bv)
    )
    ref2 = attention_head_ref(x2, w, bw, v, bv)
    assert out2.shape == (B2, C)
    assert jnp.allclose(out2.astype(jnp.float32), ref2, atol=5e-2, rtol=5e-2)

    print("KERNEL_OK")
</pallas_src>

<mosaic_0001>
module attributes {stable_mosaic.version = 11 : i64} {
  func.func @_attention_head_kernel(%arg0: i32, %arg1: memref<4x8x32xf32, #tpu.memory_space<vmem>>, %arg2: memref<32x32xf32, #tpu.memory_space<vmem>>, %arg3: memref<1x32xf32, #tpu.memory_space<vmem>>, %arg4: memref<1x32xf32, #tpu.memory_space<vmem>>, %arg5: memref<1x4x32xf32, #tpu.memory_space<vmem>>) attributes {dimension_semantics = [#tpu.dimension_semantics<parallel>], iteration_bounds = array<i64: 1>, scalar_prefetch = 0 : i64, scratch_operands = 0 : i64, tpu.core_type = #tpu.core_type<tc>, window_params = [{transform_indices = @transform_0, window_bounds = array<i64: 4, 8, 32>}, {pipeline_mode = #tpu.pipeline_mode<synchronous>, transform_indices = @transform_1, window_bounds = array<i64: 32, 32>}, {pipeline_mode = #tpu.pipeline_mode<synchronous>, transform_indices = @transform_2, window_bounds = array<i64: 1, 32>}, {pipeline_mode = #tpu.pipeline_mode<synchronous>, transform_indices = @transform_3, window_bounds = array<i64: 1, 32>}, {transform_indices = @transform_4, window_bounds = array<i64: 1, 4, 32>}]} {
    %c0 = arith.constant 0 : index
    %c0_0 = arith.constant 0 : index
    %c0_1 = arith.constant 0 : index
    %0 = vector.load %arg1[%c0, %c0_0, %c0_1] : memref<4x8x32xf32, #tpu.memory_space<vmem>>, vector<4x8x32xf32>
    %1 = vector.shape_cast %0 : vector<4x8x32xf32> to vector<32x32xf32>
    %c0_2 = arith.constant 0 : index
    %c0_3 = arith.constant 0 : index
    %2 = vector.load %arg2[%c0_2, %c0_3] : memref<32x32xf32, #tpu.memory_space<vmem>>, vector<32x32xf32>
    %cst = arith.constant dense<0.000000e+00> : vector<32x32xf32>
    %3 = tpu.matmul %1, %2, %cst {dimension_numbers = #tpu.dot_dimension_numbers<[1], [0], [0], [1], [0, 0, 1, 1], [], []>} : vector<32x32xf32>, vector<32x32xf32>, vector<32x32xf32> -> vector<32x32xf32>
    %c0_4 = arith.constant 0 : index
    %c0_5 = arith.constant 0 : index
    %4 = vector.load %arg3[%c0_4, %c0_5] : memref<1x32xf32, #tpu.memory_space<vmem>>, vector<1x32xf32>
    %5 = vector.broadcast %4 : vector<1x32xf32> to vector<32x32xf32>
    %6 = arith.addf %3, %5 : vector<32x32xf32>
    %7 = math.tanh %6 : vector<32x32xf32>
    %c0_6 = arith.constant 0 : index
    %c0_7 = arith.constant 0 : index
    %8 = vector.load %arg4[%c0_6, %c0_7] : memref<1x32xf32, #tpu.memory_space<vmem>>, vector<1x32xf32>
    %9 = vector.broadcast %8 : vector<1x32xf32> to vector<32x32xf32>
    %10 = arith.mulf %7, %9 : vector<32x32xf32>
    %cst_8 = arith.constant dense<0.000000e+00> : vector<32xf32>
    %11 = vector.multi_reduction <add>, %10, %cst_8 [1] : vector<32x32xf32> to vector<32xf32>
    %12 = vector.shape_cast %11 : vector<32xf32> to vector<32x1xf32>
    %13 = vector.shape_cast %12 : vector<32x1xf32> to vector<4x8x1xf32>
    %cst_9 = arith.constant dense<0xFF800000> : vector<4x1xf32>
    %14 = vector.multi_reduction <maximumf>, %13, %cst_9 [1] : vector<4x8x1xf32> to vector<4x1xf32>
    %15 = vector.shape_cast %14 : vector<4x1xf32> to vector<4x1x1xf32>
    %16 = vector.broadcast %15 : vector<4x1x1xf32> to vector<4x8x1xf32>
    %17 = arith.subf %13, %16 : vector<4x8x1xf32>
    %18 = math.exp %17 : vector<4x8x1xf32>
    %cst_10 = arith.constant dense<0.000000e+00> : vector<4x1xf32>
    %19 = vector.multi_reduction <add>, %18, %cst_10 [1] : vector<4x8x1xf32> to vector<4x1xf32>
    %20 = vector.broadcast %18 : vector<4x8x1xf32> to vector<4x8x32xf32>
    %21 = arith.mulf %20, %0 : vector<4x8x32xf32>
    %cst_11 = arith.constant dense<0.000000e+00> : vector<4x32xf32>
    %22 = vector.multi_reduction <add>, %21, %cst_11 [1] : vector<4x8x32xf32> to vector<4x32xf32>
    %23 = tpu.reciprocal %19 {approx = true} : vector<4x1xf32> -> vector<4x1xf32>
    %24 = vector.broadcast %23 : vector<4x1xf32> to vector<4x32xf32>
    %25 = arith.mulf %22, %24 : vector<4x32xf32>
    %26 = vector.shape_cast %25 : vector<4x32xf32> to vector<1x4x32xf32>
    %c0_12 = arith.constant 0 : index
    %c0_13 = arith.constant 0 : index
    %c0_14 = arith.constant 0 : index
    %27 = vector.load %arg5[%c0_12, %c0_13, %c0_14] : memref<1x4x32xf32, #tpu.memory_space<vmem>>, vector<1x4x32xf32>
    tpu.vector_store %arg5[%c0_12, %c0_13, %c0_14], %26 {strides = array<i32>} : memref<1x4x32xf32, #tpu.memory_space<vmem>>, vector<1x4x32xf32>,
    return
  }
  func.func @transform_0(%arg0: i32) -> (i32, i32, i32) {
    %c0_i32 = arith.constant 0 : i32
    %c0_i32_0 = arith.constant 0 : i32
    %c0_i32_1 = arith.constant 0 : i32
    return %arg0, %c0_i32, %c0_i32_0 : i32, i32, i32
  }
  func.func @transform_1(%arg0: i32) -> (i32, i32) {
    %c0_i32 = arith.constant 0 : i32
    %c0_i32_0 = arith.constant 0 : i32
    %c0_i32_1 = arith.constant 0 : i32
    return %c0_i32, %c0_i32_0 : i32, i32
  }
  func.func @transform_2(%arg0: i32) -> (i32, i32) {
    %c0_i32 = arith.constant 0 : i32
    %c0_i32_0 = arith.constant 0 : i32
    %c0_i32_1 = arith.constant 0 : i32
    return %c0_i32, %c0_i32_0 : i32, i32
  }
  func.func @transform_3(%arg0: i32) -> (i32, i32) {
    %c0_i32 = arith.constant 0 : i32
    %c0_i32_0 = arith.constant 0 : i32
    %c0_i32_1 = arith.constant 0 : i32
    return %c0_i32, %c0_i32_0 : i32, i32
  }
  func.func @transform_4(%arg0: i32) -> (i32, i32, i32) {
    %c0_i32 = arith.constant 0 : i32
    %c0_i32_0 = arith.constant 0 : i32
    %c0_i32_1 = arith.constant 0 : i32
    return %arg0, %c0_i32, %c0_i32_0 : i32, i32, i32
  }
}

</mosaic_0001>

<bundles_post_ra>
// kernel: tpu_custom_call.1
= control target key start
LH: loop header
LB: loop body
LE: loop exit
PB: predicated region body
PF: predicated region fallthrough
CT: control target
= control target key end

     0   :  { %9 = vsyncpa [#allocation3], 0  ;;  %s519_s0 = inlined_call_operand.hbm [shape: f32[4,8,32], index: 0, kind: input, shape index: {}]   ;;  %s520_s1 = inlined_call_operand.hbm [shape: f32[32,32], index: 1, kind: input, shape index: {}]   ;;  %s521_s2 = inlined_call_operand.vmem [shape: f32[1,32], index: 2, kind: input, shape index: {}]   ;;  %s522_s3 = inlined_call_operand.vmem [shape: f32[1,32], index: 3, kind: input, shape index: {}]   ;;  %s523_s4 = inlined_call_operand.hbm [shape: f32[1,4,32], index: 4, kind: output, shape index: {}]  }
   0x1   :  { %10 = vsyncpa [#allocation6], 0 }
   0x2   :  { %11 = vsyncpa [#allocation4], 0  ;;  %s446_s15 = smov [#allocation2]  }
   0x3   :  { %s17_s16 = sshll.u32 %s446_s15, 4  ;;  %s18_s16 = int_to_ptr.vmem [resolvable:$true] %s17_s16 }
   0x4   :  { %s388_s17 = scalar_lea.vmem %s18_s16, 512  ;;  %p393_p1 = scmp.lt.s32.totalorder %s18_s16, %s18_s16 }
   0x5   :  { %p389_p0 = scmp.ne.s32.totalorder %s18_s16, %s388_s17  ;;  %p394_p2 = scmp.lt.s32.totalorder %s388_s17, %s388_s17 }
   0x7   :  { %p395_p3 = por %p394_p2, %p393_p1 }
   0x9   :  { %p396_p4 = pnand %p395_p3, %p389_p0 }
   0xb   :  { %399 = shalt.err (!%p396_p4)
}
   0xc   :  { %s447_s18 = smov 128   ;;  %s448_s19 = smov 8  }
   0xd   :  { %23 = dma.hbm_to_vmem [thread:$0]  %s519_s0, 512, %s18_s16, [#allocation3], %s447_s18, %s447_s18, %s448_s19  }
   0xe   :  { %s449_s22 = smov [#allocation5]  }
   0xf   :  { %s29_s23 = sshll.u32 %s449_s22, 4  ;;  %s30_s23 = int_to_ptr.vmem [resolvable:$true] %s29_s23 }
  0x10   :  { %s408_s24 = scalar_lea.vmem %s30_s23, 512  ;;  %p413_p6 = scmp.lt.s32.totalorder %s30_s23, %s30_s23 }
  0x11   :  { %p409_p5 = scmp.ne.s32.totalorder %s30_s23, %s408_s24  ;;  %p414_p7 = scmp.lt.s32.totalorder %s408_s24, %s408_s24 }
  0x13   :  { %p415_p8 = por %p414_p7, %p413_p6 }
  0x15   :  { %p416_p9 = pnand %p415_p8, %p409_p5 }
  0x17   :  { %419 = shalt.err (!%p416_p9)
}
  0x18   :  { %35 = dma.hbm_to_vmem [thread:$0]  %s520_s1, 512, %s30_s23, [#allocation6], %s447_s18, %s447_s18, %s448_s19  }
  0x19   :  { %440 = dma.done.wait [#allocation3], 512  }
  0x1a   :  { %441 = vsyncadd [#allocation3], 4294966784 }
  0x1b   :  { %442 = dma.done.wait [#allocation6], 512  }
  0x1c   :  { %443 = vsyncadd [#allocation6], 4294966784  ;;  %v53_v0 = vld [vmem:[#allocation5 + $0x18] sm:$0xff]  ;;  %v52_v1 = vld [vmem:[#allocation5 + $0x10] sm:$0xff]  ;;  %vm61_vm0 = vcmask 261120   ;;  %vm290_vm1 = vcmask 1041409  }
  0x1d   :  { %329 = vmatprep.subr.mxu0 %v53_v0  ;;  %343 = vmatprep.subr.mxu1 %v53_v0  ;;  %v51_v2 = vld [vmem:[#allocation5 + $0x8] sm:$0xff]  ;;  %v50_v3 = vld [vmem:[#allocation5] sm:$0xff]  ;;  %v484_v5 = vld [vmem:[#allocation2 + $0x10] sm:$0xff]  ;;  %vm292_vm2 = vcmask 1042434   ;;  %vm294_vm3 = vcmask 1043459   ;;  %vm297_vm4 = vcmask 257024  }
  0x1e   :  { %330 = vmatpush3.msra.mxu0 %v53_v0  ;;  %347 = vmatpush3.msra.mxu1 %v53_v0  ;;  %v482_v4 = vld [vmem:[#allocation2] sm:$0xff]  ;;  %v486_v6 = vld [vmem:[#allocation2 + $0x8] sm:$0xff]  ;;  %v488_v7 = vld [vmem:[#allocation2 + $0x18] sm:$0xff] }
  0x1f   :  { %331 = vmatprep.subr.mxu0 %v52_v1  ;;  %344 = vmatprep.subr.mxu1 %v52_v1  ;;  %v315_v8 = vld [vmem:[%s521_s2] ss:$0 sm:$0xff]  ;;  %s450_s2 = smov [#allocation7]  }
  0x20   :  { %332 = vmatpush3.msra.mxu0 %v52_v1  ;;  %348 = vmatpush3.msra.mxu1 %v52_v1  ;;  %v320_v20 = vld [vmem:[%s522_s3] ss:$0 sm:$0xff]  ;;  %s305_s3 = sshll.u32 %s450_s2, 4  ;;  %s306_s3 = int_to_ptr.vmem [resolvable:$true] %s305_s3 }
  0x21   :  { %333 = vmatprep.subr.mxu0 %v51_v2  ;;  %345 = vmatprep.subr.mxu1 %v51_v2  ;;  %s420_s29 = scalar_lea.vmem %s306_s3, 64  ;;  %p425_p11 = scmp.lt.s32.totalorder %s306_s3, %s306_s3 }
  0x22   :  { %334 = vmatpush3.msra.mxu0 %v51_v2  ;;  %349 = vmatpush3.msra.mxu1 %v51_v2  ;;  %p421_p10 = scmp.ne.s32.totalorder %s306_s3, %s420_s29  ;;  %p426_p12 = scmp.lt.s32.totalorder %s420_s29, %s420_s29 }
  0x23   :  { %335 = vmatprep.subr.mxu0 %v50_v3  ;;  %346 = vmatprep.subr.mxu1 %v50_v3 }
  0x24   :  { %336 = vmatpush3.msra.mxu0 %v50_v3  ;;  %350 = vmatpush3.msra.mxu1 %v50_v3  ;;  %p427_p13 = por %p426_p12, %p425_p11 }
  0x25   :  { %337 = vmatprep.mubr.msk.f32.mxu0 %vm61_vm0, %v482_v4  ;;  %340 = vmatprep.mubr.msk.f32.mxu1 %vm61_vm0, %v484_v5 }
  0x26   :  { %338 = vmatmul.mubr.msk.f32.vlgmr.msra.gmra.mxu0 %vm61_vm0, %v486_v6  ;;  %341 = vmatmul.mubr.msk.f32.vlgmr.msra.gmra.mxu1 %vm61_vm0, %v488_v7  ;;  %p428_p0 = pnand %p427_p13, %p421_p10 }
  0xe6   :  { %v339_v9 = vpop.f32.mrf.mxu0  ;;  %v342_v10 = vpop.f32.mrf.mxu1 }
  0xe7   :  { %v146_v11 = vadd.f32 %v339_v9, %v315_v8  ;;  %v156_v12 = vadd.f32 %v342_v10, %v315_v8 }
  0xe8   :  { %v140_v13 = vpop.f32.mrf.mxu0  ;;  %v150_v14 = vpop.f32.mrf.mxu1 }
  0xe9   :  { %356 = vtanh.f32 %v146_v11  ;;  %v141_v15 = vadd.f32 %v315_v8, %v140_v13  ;;  %v151_v16 = vadd.f32 %v315_v8, %v150_v14 }
  0xea   :  { %358 = vtanh.f32 %v156_v12 }
  0xeb   :  { %360 = vtanh.f32 %v141_v15 }
  0xec   :  { %362 = vtanh.f32 %v151_v16 }
  0xf6   :  { %v357_v17 = vpop.eup %356 }
  0xf7   :  { %v359_v18 = vpop.eup %358  ;;  %v171_v25 = vmul.f32 %v357_v17, %v320_v20 }
  0xf8   :  { %v361_v19 = vpop.eup %360  ;;  %v173_v27 = vmul.f32 %v359_v18, %v320_v20 }
  0xf9   :  { %v363_v21 = vpop.eup %362  ;;  %v170_v22 = vmul.f32 %v361_v19, %v320_v20  ;;  %v177_v28 = vsel %vm61_vm0, %v171_v25, 0.0 }
  0xfa   :  { %v172_v23 = vmul.f32 %v363_v21, %v320_v20  ;;  %v183_v29 = vsel %vm61_vm0, %v173_v27, 0.0 }
  0xfb   :  { %v174_v24 = vsel %vm61_vm0, %v170_v22, 0.0 }
  0xfc   :  { %v180_v26 = vsel %vm61_vm0, %v172_v23, 0.0  ;;  %175 = vadd.xlane.f32.xlu0 %v174_v24 }
  0xfd   :  { %181 = vadd.xlane.f32.xlu1 %v180_v26 }
 0x100   :  { %178 = vadd.xlane.f32.xlu0 %v177_v28 }
 0x101   :  { %184 = vadd.xlane.f32.xlu1 %v183_v29 }
 0x185   :  { %v176_v30 = vpop.xlane.xlu0 %175 }
 0x186   :  { %v182_v31 = vpop.xlane.xlu1 %181  ;;  %v186_v32 = vrot.slane %v176_v30, 4 }
 0x187   :  { %v198_v33 = vrot.slane %v182_v31, 4 }
 0x188   :  { %v187_v34 = vmax.f32 %v176_v30, %v186_v32 }
 0x189   :  { %v199_v35 = vmax.f32 %v182_v31, %v198_v33  ;;  %v179_v36 = vpop.xlane.xlu0 %178 }
 0x18a   :  { %v188_v37 = vrot.slane %v187_v34, 2  ;;  %v185_v38 = vpop.xlane.xlu1 %184  ;;  %v192_v39 = vrot.slane %v179_v36, 4 }
 0x18b   :  { %v200_v40 = vrot.slane %v199_v35, 2  ;;  %v204_v41 = vrot.slane %v185_v38, 4 }
 0x18c   :  { %v189_v42 = vmax.f32 %v187_v34, %v188_v37  ;;  %v193_v43 = vmax.f32 %v179_v36, %v192_v39 }
 0x18d   :  { %v201_v44 = vmax.f32 %v199_v35, %v200_v40  ;;  %v205_v45 = vmax.f32 %v185_v38, %v204_v41 }
 0x18e   :  { %v190_v46 = vrot.slane %v189_v42, 1  ;;  %v194_v47 = vrot.slane %v193_v43, 2 }
 0x18f   :  { %v202_v48 = vrot.slane %v201_v44, 1  ;;  %v206_v49 = vrot.slane %v205_v45, 2 }
 0x190   :  { %v191_v50 = vmax.f32 %v189_v42, %v190_v46  ;;  %v195_v51 = vmax.f32 %v193_v43, %v194_v47 }
 0x191   :  { %v203_v52 = vmax.f32 %v201_v44, %v202_v48  ;;  %v207_v53 = vmax.f32 %v205_v45, %v206_v49 }
 0x192   :  { %v210_v54 = vsub.f32 %v176_v30, %v191_v50  ;;  %v196_v55 = vrot.slane %v195_v51, 1 }
 0x193   :  { %v212_v56 = vsub.f32 %v182_v31, %v203_v52  ;;  %v208_v57 = vrot.slane %v207_v53, 1 }
 0x194   :  { %v214_v58 = vmul.f32 1.442695, %v210_v54  ;;  %v197_v59 = vmax.f32 %v195_v51, %v196_v55 }
 0x195   :  { %v218_v60 = vmul.f32 1.442695, %v212_v56  ;;  %v209_v61 = vmax.f32 %v207_v53, %v208_v57 }
 0x196   :  { %364 = vpow2.f32 %v214_v58  ;;  %v211_v62 = vsub.f32 %v179_v36, %v197_v59 }
 0x197   :  { %366 = vpow2.f32 %v218_v60  ;;  %v213_v63 = vsub.f32 %v185_v38, %v209_v61 }
 0x198   :  { %v216_v0 = vmul.f32 1.442695, %v211_v62 }
 0x199   :  { %v220_v1 = vmul.f32 1.442695, %v213_v63 }
 0x19a   :  { %368 = vpow2.f32 %v216_v0 }
 0x19b   :  { %370 = vpow2.f32 %v220_v1 }
 0x1a3   :  { %v365_v2 = vpop.eup %364 }
 0x1a4   :  { %v367_v3 = vpop.eup %366  ;;  %v222_v8 = vrot.slane %v365_v2, 4  ;;  %v246_v9 = vmul.f32 %v365_v2, %v482_v4 }
 0x1a5   :  { %v234_v10 = vrot.slane %v367_v3, 4  ;;  %v248_v12 = vmul.f32 %v367_v3, %v484_v5 }
 0x1a6   :  { %v223_v11 = vadd.f32 %v365_v2, %v222_v8  ;;  %v250_v19 = vsel %vm61_vm0, %v246_v9, 0.0 }
 0x1a7   :  { %v369_v13 = vpop.eup %368  ;;  %v235_v14 = vadd.f32 %v367_v3, %v234_v10  ;;  %v264_v25 = vsel %vm61_vm0, %v248_v12, 0.0  ;;  %v251_v27 = vrot.slane %v250_v19, 4 }
 0x1a8   :  { %v371_v15 = vpop.eup %370  ;;  %v224_v16 = vrot.slane %v223_v11, 2  ;;  %v228_v17 = vrot.slane %v369_v13, 4  ;;  %v247_v18 = vmul.f32 %v369_v13, %v486_v6  ;;  %v265_v33 = vrot.slane %v264_v25, 4 }
 0x1a9   :  { %v236_v20 = vrot.slane %v235_v14, 2  ;;  %v240_v21 = vrot.slane %v371_v15, 4  ;;  %v249_v22 = vmul.f32 %v371_v15, %v488_v7  ;;  %v252_v39 = vadd.f32 %v251_v27, %v250_v19 }
 0x1aa   :  { %v225_v23 = vadd.f32 %v224_v16, %v223_v11  ;;  %v229_v24 = vadd.f32 %v369_v13, %v228_v17  ;;  %v257_v4 = vsel %vm61_vm0, %v247_v18, 0.0  ;;  %v266_v42 = vadd.f32 %v265_v33, %v264_v25 }
 0x1ab   :  { %v237_v5 = vadd.f32 %v236_v20, %v235_v14  ;;  %v241_v26 = vadd.f32 %v371_v15, %v240_v21  ;;  %v258_v30 = vrot.slane %v257_v4, 4  ;;  %v271_v6 = vsel %vm61_vm0, %v249_v22, 0.0 }
 0x1ac   :  { %v226_v28 = vrot.slane %v225_v23, 1  ;;  %v230_v29 = vrot.slane %v229_v24, 2  ;;  %v272_v7 = vrot.slane %v271_v6, 4  ;;  %v253_v46 = vrot.slane %v252_v39, 2 }
 0x1ad   :  { %v238_v31 = vrot.slane %v237_v5, 1  ;;  %v242_v32 = vrot.slane %v241_v26, 2  ;;  %v259_v40 = vadd.f32 %v258_v30, %v257_v4  ;;  %v267_v48 = vrot.slane %v266_v42, 2 }
 0x1ae   :  { %v227_v34 = vadd.f32 %v226_v28, %v225_v23  ;;  %v231_v35 = vadd.f32 %v230_v29, %v229_v24  ;;  %v273_v44 = vadd.f32 %v272_v7, %v271_v6  ;;  %v254_v50 = vadd.f32 %v253_v46, %v252_v39 }
 0x1af   :  { %v239_v36 = vadd.f32 %v238_v31, %v237_v5  ;;  %v243_v37 = vadd.f32 %v242_v32, %v241_v26  ;;  %v260_v47 = vrot.slane %v259_v40, 2  ;;  %v268_v52 = vadd.f32 %v267_v48, %v266_v42 }
 0x1b0   :  { %v232_v38 = vrot.slane %v231_v35, 1  ;;  %372 = vrcp.f32 %v227_v34  ;;  %v274_v49 = vrot.slane %v273_v44, 2  ;;  %v255_v54 = vrot.slane %v254_v50, 1 }
 0x1b1   :  { %v244_v41 = vrot.slane %v243_v37, 1  ;;  %374 = vrcp.f32 %v239_v36  ;;  %v261_v51 = vadd.f32 %v260_v47, %v259_v40  ;;  %v269_v56 = vrot.slane %v268_v52, 1 }
 0x1b2   :  { %v233_v43 = vadd.f32 %v232_v38, %v231_v35  ;;  %v275_v53 = vadd.f32 %v274_v49, %v273_v44  ;;  %v256_v60 = vadd.f32 %v255_v54, %v254_v50 }
 0x1b3   :  { %v245_v45 = vadd.f32 %v244_v41, %v243_v37  ;;  %v262_v55 = vrot.slane %v261_v51, 1  ;;  %v270_v63 = vadd.f32 %v269_v56, %v268_v52 }
 0x1b4   :  { %376 = vrcp.f32 %v233_v43  ;;  %v276_v57 = vrot.slane %v275_v53, 1 }
 0x1b5   :  { %378 = vrcp.f32 %v245_v45  ;;  %v263_v61 = vadd.f32 %v262_v55, %v261_v51 }
 0x1b6   :  { %v277_v1 = vadd.f32 %v276_v57, %v275_v53 }
 0x1bd   :  { %v373_v58 = vpop.eup %372 }
 0x1be   :  { %v375_v59 = vpop.eup %374  ;;  %v282_v2 = vmul.f32 %v373_v58, %v256_v60 }
 0x1bf   :  { %v284_v8 = vmul.f32 %v375_v59, %v270_v63 }
 0x1c1   :  { %v377_v62 = vpop.eup %376 }
 0x1c2   :  { %v379_v0 = vpop.eup %378  ;;  %v283_v3 = vmul.f32 %v377_v62, %v263_v61 }
 0x1c3   :  { %v285_v9 = vmul.f32 %v379_v0, %v277_v1 }
 0x1c4   :  { %v291_v10 = vsel %vm290_vm1, %v283_v3, %v282_v2 }
 0x1c5   :  { %v293_v11 = vsel %vm292_vm2, %v284_v8, %v291_v10 }
 0x1c6   :  { %v295_v12 = vsel %vm294_vm3, %v285_v9, %v293_v11 }
 0x1c7   :  { %298 = vst.msk [vmem:[#allocation7] sm:$0xf] %vm297_vm4, %v295_v12 }
 0x1c8   :  { %431 = shalt.err (!%p428_p0)
}
 0x1c9   :  { %308 = dma.vmem_to_hbm [thread:$0]  %s306_s3, 64, %s523_s4, [#allocation4]  }
 0x1ca   :  { %444 = dma.done.wait [#allocation4], 64  }
 0x1cb   :  { %445 = vsyncadd [#allocation4], 4294967232 }
 0x1cc   :  { %312 = vsyncpa [#allocation3], 1 }
 0x1cd   :  { %313 = vsyncpa [#allocation6], 1 }
 0x1ce   :  { %314 = vsyncpa [#allocation4], 1 }

</bundles_post_ra>
